<compile_context>
chip_gen: v7x
topology: tpu7x:2x2x1
jax: 0.10.0
libtpu: 0.0.40
codegen_flags: <defaults>
</compile_context>

<pallas_src>
import jax
import jax.numpy as jnp
from jax.experimental import pallas as pl
from jax.experimental.pallas import tpu as pltpu


def _round_up(n: int, m: int) -> int:
    return ((n + m - 1) // m) * m


def ann_kernel(x_ref, w1_ref, b1_ref, w2_ref, b2_ref, o_ref):
    # x_ref : (TB, I) f32   (natural batch-major layout, streamed per grid step)
    # w1_ref: (H, I)  f32   (fc1.weight, native layout)
    # b1_ref: (H, 1)  f32
    # w2_ref: (O, H)  f32   (fc2.weight, native layout)
    # b2_ref: (O, 1)  f32
    # o_ref : (O, TB) f32   (feature-major, lane-dense output block)

    # fc1, feature-major: h_t[h, b] = sum_i w1[h, i] * x[b, i]   -> (H, TB)
    h_t = jax.lax.dot_general(
        w1_ref[...], x_ref[...],
        dimension_numbers=(((1,), (1,)), ((), ())),
        preferred_element_type=jnp.float32,
    )
    h_t = jnp.maximum(h_t + b1_ref[...], 0.0)            # bias + ReLU on (H, TB), lane-dense

    # fc2: z_t[o, b] = sum_h w2[o, h] * h_t[h, b]         -> (O, TB)
    z_t = jnp.dot(w2_ref[...], h_t, preferred_element_type=jnp.float32)
    o_ref[...] = jax.nn.sigmoid(z_t + b2_ref[...]).astype(o_ref.dtype)


def ann_forward(x, w1, b1, w2, b2, *, tb=None):
    """Fused ANN forward pass.

    x : (B, input_size) float32
    w1: (hidden, input_size)  = fc1.weight   b1: (hidden,)  = fc1.bias
    w2: (output, hidden)      = fc2.weight   b2: (output,)  = fc2.bias
    returns (B, output_size) float32

    tb: batch tile.  Default = whole (128-aligned) batch up to 2048, i.e. a
    single grid step.  On v7x, pass tb = B // 2 to use both TensorCores.
    """
    B, I = x.shape
    H = w1.shape[0]
    O = w2.shape[0]

    if tb is None:
        tb = min(_round_up(B, 128), 2048)
    else:
        tb = _round_up(tb, 128)

    n_tiles = pl.cdiv(B, tb)
    Bp = n_tiles * tb
    if Bp != B:
        x = jnp.pad(x, ((0, Bp - B), (0, 0)))

    b1c = b1.reshape(H, 1)
    b2c = b2.reshape(O, 1)

    out_t = pl.pallas_call(
        ann_kernel,
        out_shape=jax.ShapeDtypeStruct((O, Bp), jnp.float32),
        grid=(n_tiles,),
        in_specs=[
            pl.BlockSpec((tb, I), lambda i: (i, 0)),   # x: streamed per batch tile
            pl.BlockSpec((H, I), lambda i: (0, 0)),    # weights & biases: VMEM-resident
            pl.BlockSpec((H, 1), lambda i: (0, 0)),
            pl.BlockSpec((O, H), lambda i: (0, 0)),
            pl.BlockSpec((O, 1), lambda i: (0, 0)),
        ],
        out_specs=pl.BlockSpec((O, tb), lambda i: (0, i)),   # lane-dense (O, TB) blocks
        compiler_params=pltpu.CompilerParams(
            dimension_semantics=("parallel",),   # harmless at 1 step; splits TCs at >=2
        ),
    )(x, w1, b1c, w2, b2c)

    # Back to nn.Module layout (B, output_size); avoid a transpose when O == 1.
    if O == 1:
        return out_t[0, :B].reshape(B, 1)
    return out_t[:, :B].T


def init_params(key, input_size, hidden_size=32, output_size=1):
    """Deterministic init mimicking PyTorch nn.Linear (uniform in +-1/sqrt(fan_in)),
    returned in native PyTorch layouts."""
    k1, k2, k3, k4 = jax.random.split(key, 4)
    bound1 = 1.0 / (input_size ** 0.5)
    bound2 = 1.0 / (hidden_size ** 0.5)
    w1 = jax.random.uniform(k1, (hidden_size, input_size), jnp.float32, -bound1, bound1)
    b1 = jax.random.uniform(k2, (hidden_size,), jnp.float32, -bound1, bound1)
    w2 = jax.random.uniform(k3, (output_size, hidden_size), jnp.float32, -bound2, bound2)
    b2 = jax.random.uniform(k4, (output_size,), jnp.float32, -bound2, bound2)
    return w1, b1, w2, b2


if __name__ == "__main__":
    key = jax.random.PRNGKey(0)
    kx, kp = jax.random.split(key)

    batch, input_size, hidden_size, output_size = 256, 16, 32, 1
    x = jax.random.normal(kx, (batch, input_size), jnp.float32)
    w1, b1, w2, b2 = init_params(kp, input_size, hidden_size, output_size)

    fwd = jax.jit(ann_forward, static_argnames=("tb",))
    out = fwd(x, w1, b1, w2, b2)
    out = jax.block_until_ready(out)

    # Pure-JAX f32 reference (same layouts as PyTorch nn.Linear).
    h_ref = jnp.maximum(x @ w1.T + b1[None, :], 0.0)
    ref = jax.nn.sigmoid(h_ref @ w2.T + b2[None, :])

    assert out.shape == (batch, output_size), out.shape
    assert jnp.allclose(out, ref, atol=5e-3, rtol=5e-3)

    print("KERNEL_OK")
</pallas_src>

<mosaic_0001>
module attributes {stable_mosaic.version = 11 : i64} {
  func.func @ann_kernel(%arg0: i32, %arg1: memref<256x16xf32, #tpu.memory_space<vmem>>, %arg2: memref<32x16xf32, #tpu.memory_space<vmem>>, %arg3: memref<32x1xf32, #tpu.memory_space<vmem>>, %arg4: memref<1x32xf32, #tpu.memory_space<vmem>>, %arg5: memref<1x1xf32, #tpu.memory_space<vmem>>, %arg6: memref<1x256xf32, #tpu.memory_space<vmem>>) attributes {dimension_semantics = [#tpu.dimension_semantics<parallel>], iteration_bounds = array<i64: 1>, scalar_prefetch = 0 : i64, scratch_operands = 0 : i64, tpu.core_type = #tpu.core_type<tc>, window_params = [{transform_indices = @transform_0, window_bounds = array<i64: 256, 16>}, {pipeline_mode = #tpu.pipeline_mode<synchronous>, transform_indices = @transform_1, window_bounds = array<i64: 32, 16>}, {pipeline_mode = #tpu.pipeline_mode<synchronous>, transform_indices = @transform_2, window_bounds = array<i64: 32, 1>}, {pipeline_mode = #tpu.pipeline_mode<synchronous>, transform_indices = @transform_3, window_bounds = array<i64: 1, 32>}, {pipeline_mode = #tpu.pipeline_mode<synchronous>, transform_indices = @transform_4, window_bounds = array<i64: 1, 1>}, {transform_indices = @transform_5, window_bounds = array<i64: 1, 256>}]} {
    %c0 = arith.constant 0 : index
    %c0_0 = arith.constant 0 : index
    %0 = vector.load %arg2[%c0, %c0_0] : memref<32x16xf32, #tpu.memory_space<vmem>>, vector<32x16xf32>
    %c0_1 = arith.constant 0 : index
    %c0_2 = arith.constant 0 : index
    %1 = vector.load %arg1[%c0_1, %c0_2] : memref<256x16xf32, #tpu.memory_space<vmem>>, vector<256x16xf32>
    %cst = arith.constant dense<0.000000e+00> : vector<32x256xf32>
    %2 = tpu.matmul %0, %1, %cst {dimension_numbers = #tpu.dot_dimension_numbers<[1], [1], [0], [0], [0, 0, 1, 0], [], []>} : vector<32x16xf32>, vector<256x16xf32>, vector<32x256xf32> -> vector<32x256xf32>
    %c0_3 = arith.constant 0 : index
    %c0_4 = arith.constant 0 : index
    %3 = vector.load %arg3[%c0_3, %c0_4] : memref<32x1xf32, #tpu.memory_space<vmem>>, vector<32x1xf32>
    %4 = vector.broadcast %3 : vector<32x1xf32> to vector<32x256xf32>
    %5 = arith.addf %2, %4 : vector<32x256xf32>
    %cst_5 = arith.constant 0.000000e+00 : f32
    %6 = vector.broadcast %cst_5 : f32 to vector<32x256xf32>
    %7 = arith.maximumf %5, %6 : vector<32x256xf32>
    %c0_6 = arith.constant 0 : index
    %c0_7 = arith.constant 0 : index
    %8 = vector.load %arg4[%c0_6, %c0_7] : memref<1x32xf32, #tpu.memory_space<vmem>>, vector<1x32xf32>
    %cst_8 = arith.constant dense<0.000000e+00> : vector<1x256xf32>
    %9 = tpu.matmul %8, %7, %cst_8 {dimension_numbers = #tpu.dot_dimension_numbers<[1], [0], [0], [1], [0, 0, 1, 1], [], []>} : vector<1x32xf32>, vector<32x256xf32>, vector<1x256xf32> -> vector<1x256xf32>
    %c0_9 = arith.constant 0 : index
    %c0_10 = arith.constant 0 : index
    %10 = vector.load %arg5[%c0_9, %c0_10] : memref<1x1xf32, #tpu.memory_space<vmem>>, vector<1x1xf32>
    %11 = vector.broadcast %10 : vector<1x1xf32> to vector<1x256xf32>
    %12 = arith.addf %9, %11 : vector<1x256xf32>
    %13 = arith.negf %12 : vector<1x256xf32>
    %14 = math.exp %13 : vector<1x256xf32>
    %cst_11 = arith.constant 1.000000e+00 : f32
    %15 = vector.broadcast %cst_11 : f32 to vector<1x256xf32>
    %16 = arith.addf %15, %14 : vector<1x256xf32>
    %17 = arith.divf %15, %16 : vector<1x256xf32>
    %c0_12 = arith.constant 0 : index
    %c0_13 = arith.constant 0 : index
    %18 = vector.load %arg6[%c0_12, %c0_13] : memref<1x256xf32, #tpu.memory_space<vmem>>, vector<1x256xf32>
    tpu.vector_store %arg6[%c0_12, %c0_13], %17 {strides = array<i32>} : memref<1x256xf32, #tpu.memory_space<vmem>>, vector<1x256xf32>,
    return
  }
  func.func @transform_0(%arg0: i32) -> (i32, i32) {
    %c0_i32 = arith.constant 0 : i32
    %c0_i32_0 = arith.constant 0 : i32
    return %arg0, %c0_i32 : i32, i32
  }
  func.func @transform_1(%arg0: i32) -> (i32, i32) {
    %c0_i32 = arith.constant 0 : i32
    %c0_i32_0 = arith.constant 0 : i32
    %c0_i32_1 = arith.constant 0 : i32
    return %c0_i32, %c0_i32_0 : i32, i32
  }
  func.func @transform_2(%arg0: i32) -> (i32, i32) {
    %c0_i32 = arith.constant 0 : i32
    %c0_i32_0 = arith.constant 0 : i32
    %c0_i32_1 = arith.constant 0 : i32
    return %c0_i32, %c0_i32_0 : i32, i32
  }
  func.func @transform_3(%arg0: i32) -> (i32, i32) {
    %c0_i32 = arith.constant 0 : i32
    %c0_i32_0 = arith.constant 0 : i32
    %c0_i32_1 = arith.constant 0 : i32
    return %c0_i32, %c0_i32_0 : i32, i32
  }
  func.func @transform_4(%arg0: i32) -> (i32, i32) {
    %c0_i32 = arith.constant 0 : i32
    %c0_i32_0 = arith.constant 0 : i32
    %c0_i32_1 = arith.constant 0 : i32
    return %c0_i32, %c0_i32_0 : i32, i32
  }
  func.func @transform_5(%arg0: i32) -> (i32, i32) {
    %c0_i32 = arith.constant 0 : i32
    %c0_i32_0 = arith.constant 0 : i32
    return %c0_i32, %arg0 : i32, i32
  }
}

</mosaic_0001>

<bundles_post_ra>
// kernel: ann_forward.1
= control target key start
LH: loop header
LB: loop body
LE: loop exit
PB: predicated region body
PF: predicated region fallthrough
CT: control target
= control target key end

     0   :  { %s815_s0 = inlined_call_operand.vmem [shape: f32[256,16], index: 0, kind: input, shape index: {}]   ;;  %s816_s1 = inlined_call_operand.vmem [shape: f32[32,16], index: 1, kind: input, shape index: {}]   ;;  %s817_s2 = inlined_call_operand.vmem [shape: f32[32,1], index: 2, kind: input, shape index: {}]   ;;  %s818_s3 = inlined_call_operand.vmem [shape: f32[1,32], index: 3, kind: input, shape index: {}]   ;;  %s819_s4 = inlined_call_operand.<no memory space> [shape: f32[1,1], index: 4, kind: input, shape index: {}]   ;;  %s820_s5 = inlined_call_operand.hbm [shape: f32[1,256], index: 5, kind: output, shape index: {}]  }
   0x1   :  { %v10_v0 = vstv %s819_s4 }
   0x2   :  { %11 = vst [vmem:[#allocation2] sm:$0x1] %v10_v0 }
   0x3   :  { %v43_v1 = vld [vmem:[%s815_s0 + $0x80] sm:$0xff]  ;;  %v44_v2 = vld [vmem:[%s815_s0 + $0x88] sm:$0xff]  ;;  %vm83_vm0 = vcmask 130048   ;;  %v45_v7 = vld [vmem:[%s815_s0 + $0x90] sm:$0xff]  ;;  %v597_v8 = vmov 0  }
   0x4   :  { %v27_v3 = vld [vmem:[%s815_s0] sm:$0xff]  ;;  %v503_v4 = vpack.c.bf16 %v44_v2, %v43_v1  ;;  %vm645_vm1 = vmpackc.low %vm83_vm0, %vm83_vm0  ;;  %v28_v6 = vld [vmem:[%s815_s0 + $0x8] sm:$0xff]  ;;  %563 = vset.pattern.permute.xlu0 %v597_v8  ;;  %564 = vset.pattern.permute.xlu1 %v597_v8 }
   0x5   :  { %v506_v9 = vpack.c.bf16 %v28_v6, %v27_v3  ;;  %v46_v10 = vld [vmem:[%s815_s0 + $0x98] sm:$0xff]  ;;  %v29_v12 = vld [vmem:[%s815_s0 + $0x10] sm:$0xff]  ;;  %v47_v14 = vld [vmem:[%s815_s0 + $0xa0] sm:$0xff] }
   0x6   :  { %505 = vmatprep.subr.msk.bf16.mxu0 %vm645_vm1, %v503_v4  ;;  %v509_v11 = vpack.c.bf16 %v46_v10, %v45_v7  ;;  %v30_v13 = vld [vmem:[%s815_s0 + $0x18] sm:$0xff]  ;;  %v48_v15 = vld [vmem:[%s815_s0 + $0xa8] sm:$0xff]  ;;  %v23_v18 = vld [vmem:[%s816_s1] sm:$0xff] }
   0x7   :  { %508 = vmatpush3.bf16.xpose.msk.msra.mxu0 %vm645_vm1, %v506_v9  ;;  %v512_v16 = vpack.c.bf16 %v30_v13, %v29_v12  ;;  %v515_v17 = vpack.c.bf16 %v48_v15, %v47_v14  ;;  %v31_v19 = vld [vmem:[%s815_s0 + $0x20] sm:$0xff]  ;;  %495 = vmatprep.mubr.msk.f32.mxu0 %vm83_vm0, %v23_v18  ;;  %v32_v21 = vld [vmem:[%s815_s0 + $0x28] sm:$0xff]  ;;  %v49_v22 = vld [vmem:[%s815_s0 + $0xb0] sm:$0xff] }
   0x8   :  { %511 = vmatprep.subr.msk.bf16.mxu0 %vm645_vm1, %v509_v11  ;;  %v59_v20 = vld [vmem:[%s817_s2] sm:$0xff]  ;;  %v61_v23 = vld [vmem:[%s817_s2 + $0x10] sm:$0xff]  ;;  %v50_v24 = vld [vmem:[%s815_s0 + $0xb8] sm:$0xff] }
   0x9   :  { %65 = vperm.xlu0 %563, %v59_v20   ;;  %v60_v25 = vld [vmem:[%s817_s2 + $0x8] sm:$0xff]  ;;  %75 = vperm.xlu1 %564, %v61_v23  }
   0xf   :  { %514 = vmatpush3.bf16.xpose.msk.msra.mxu0 %vm645_vm1, %v512_v16 }
  0x10   :  { %517 = vmatprep.subr.msk.bf16.mxu0 %vm645_vm1, %v515_v17 }
  0x11   :  { %12 = vsyncpa [#allocation4], 0  ;;  %v62_v26 = vld [vmem:[%s817_s2 + $0x18] sm:$0xff]  ;;  %v518_v27 = vpack.c.bf16 %v32_v21, %v31_v19  ;;  %v521_v28 = vpack.c.bf16 %v50_v24, %v49_v22  ;;  %70 = vperm.xlu0 %563, %v60_v25   ;;  %v290_v29 = vld [vmem:[#allocation2] sm:$0x1]  ;;  %v598_v60 = vmov 0.0  }
  0x12   :  { %80 = vperm.xlu1 %564, %v62_v26   ;;  %v33_v30 = vld [vmem:[%s815_s0 + $0x30] sm:$0xff]  ;;  %v34_v31 = vld [vmem:[%s815_s0 + $0x38] sm:$0xff]  ;;  %v51_v32 = vld [vmem:[%s815_s0 + $0xc0] sm:$0xff]  ;;  %368 = vmatprep.mubr.f32.mxu1 %v598_v60  ;;  %vm300_vm2 = vcmask 261120  }
  0x13   :  { %v52_v33 = vld [vmem:[%s815_s0 + $0xc8] sm:$0xff]  ;;  %v524_v34 = vpack.c.bf16 %v34_v31, %v33_v30  ;;  %v35_v36 = vld [vmem:[%s815_s0 + $0x40] sm:$0xff]  ;;  %v53_v38 = vld [vmem:[%s815_s0 + $0xd0] sm:$0xff]  ;;  %v296_v30 = vlaneseq }
  0x14   :  { %v527_v35 = vpack.c.bf16 %v52_v33, %v51_v32  ;;  %v36_v37 = vld [vmem:[%s815_s0 + $0x48] sm:$0xff]  ;;  %v54_v39 = vld [vmem:[%s815_s0 + $0xd8] sm:$0xff]  ;;  %v37_v42 = vld [vmem:[%s815_s0 + $0x50] sm:$0xff] }
  0x15   :  { %293 = vperm.xlu0 %563, %v290_v29   ;;  %v530_v40 = vpack.c.bf16 %v36_v37, %v35_v36  ;;  %v533_v41 = vpack.c.bf16 %v54_v39, %v53_v38  ;;  %v38_v43 = vld [vmem:[%s815_s0 + $0x58] sm:$0xff]  ;;  %v55_v44 = vld [vmem:[%s815_s0 + $0xe0] sm:$0xff]  ;;  %v56_v45 = vld [vmem:[%s815_s0 + $0xe8] sm:$0xff]  ;;  %v297_v31 = vshrl.u32 %v296_v30, 7  ;;  %vm407_vm3 = vcmp.lt.s32.totalorder %v296_v30, 256 }
  0x16   :  { %v536_v46 = vpack.c.bf16 %v38_v43, %v37_v42  ;;  %v539_v47 = vpack.c.bf16 %v56_v45, %v55_v44  ;;  %v39_v48 = vld [vmem:[%s815_s0 + $0x60] sm:$0xff]  ;;  %v40_v49 = vld [vmem:[%s815_s0 + $0x68] sm:$0xff]  ;;  %v57_v50 = vld [vmem:[%s815_s0 + $0xf0] sm:$0xff]  ;;  %v599_v45 = vmov 1966171168  }
  0x17   :  { %520 = vmatpush3.bf16.xpose.msk.msra.mxu0 %vm645_vm1, %v518_v27  ;;  %v58_v51 = vld [vmem:[%s815_s0 + $0xf8] sm:$0xff]  ;;  %v542_v52 = vpack.c.bf16 %v40_v49, %v39_v48  ;;  %v41_v54 = vld [vmem:[%s815_s0 + $0x70] sm:$0xff]  ;;  %v24_v57 = vld [vmem:[%s816_s1 + $0x8] sm:$0xff]  ;;  %v298_v32 = vsub.s32 0, %v297_v31 }
  0x18   :  { %523 = vmatprep.subr.msk.bf16.mxu0 %vm645_vm1, %v521_v28  ;;  %v545_v53 = vpack.c.bf16 %v58_v51, %v57_v50  ;;  %v42_v55 = vld [vmem:[%s815_s0 + $0x78] sm:$0xff]  ;;  %v25_v58 = vld [vmem:[%s816_s1 + $0x10] sm:$0xff]  ;;  %v289_v29 = vld [vmem:[%s818_s3] sm:$0x1]  ;;  %s600_s3 = smov [#allocation3]  }
  0x19   :  { %v548_v56 = vpack.c.bf16 %v42_v55, %v41_v54  ;;  %v26_v59 = vld [vmem:[%s816_s1 + $0x18] sm:$0xff]  ;;  %s416_s20 = sshll.u32 %s600_s3, 4  ;;  %s417_s20 = int_to_ptr.vmem [resolvable:$true] %s416_s20 }
  0x1a   :  { %s573_s21 = scalar_lea.vmem %s417_s20, 32  ;;  %p578_p1 = scmp.lt.s32.totalorder %s417_s20, %s417_s20 }
  0x1b   :  { %p574_p0 = scmp.ne.s32.totalorder %s417_s20, %s573_s21  ;;  %p579_p2 = scmp.lt.s32.totalorder %s573_s21, %s573_s21 }
  0x1d   :  { %p580_p3 = por %p579_p2, %p578_p1 }
  0x1f   :  { %526 = vmatpush3.bf16.xpose.msk.msra.mxu0 %vm645_vm1, %v524_v34  ;;  %p581_p4 = pnand %p580_p3, %p574_p0 }
  0x20   :  { %529 = vmatprep.subr.msk.bf16.mxu0 %vm645_vm1, %v527_v35 }
  0x27   :  { %532 = vmatpush3.bf16.xpose.msk.msra.mxu0 %vm645_vm1, %v530_v40 }
  0x28   :  { %535 = vmatprep.subr.msk.bf16.mxu0 %vm645_vm1, %v533_v41 }
  0x2f   :  { %538 = vmatpush3.bf16.xpose.msk.msra.mxu0 %vm645_vm1, %v536_v46  ;;  %v391_v46 = vunpack.c.l.s4 %v599_v45 }
  0x30   :  { %541 = vmatprep.subr.msk.bf16.mxu0 %vm645_vm1, %v539_v47 }
  0x31   :  { %v392_v47 = vunpack.c.0.s8 %v391_v46 }
  0x33   :  { %v395_v49 = vsub.s32 %v392_v47, %v297_v31 }
  0x37   :  { %544 = vmatpush3.bf16.xpose.msk.msra.mxu0 %vm645_vm1, %v542_v52 }
  0x38   :  { %547 = vmatprep.subr.msk.bf16.mxu0 %vm645_vm1, %v545_v53 }
  0x3f   :  { %550 = vmatpush3.bf16.xpose.msk.msra.mxu0 %vm645_vm1, %v548_v56 }
  0x46   :  { %496 = vmatmul.mubr.msk.f32.vlgmr.msra.gmra.mrb[0].mxu0 %vm83_vm0, %v23_v18 }
  0x47   :  { %497 = vmatprep.mubr.msk.f32.mxu0 %vm83_vm0, %v24_v57 }
  0x4a   :  { %498 = vmatmul.mubr.msk.f32.gmra.mrb[2].mxu0 %vm83_vm0, %v24_v57 }
  0x4b   :  { %499 = vmatprep.mubr.msk.f32.mxu0 %vm83_vm0, %v25_v58 }
  0x4e   :  { %500 = vmatmul.mubr.msk.f32.gmra.mrb[4].mxu0 %vm83_vm0, %v25_v58 }
  0x4f   :  { %501 = vmatprep.mubr.msk.f32.mxu0 %vm83_vm0, %v26_v59 }
  0x52   :  { %502 = vmatmul.mubr.msk.f32.gmra.mrb[6].mxu0 %vm83_vm0, %v26_v59 }
  0x88   :  { %v66_v61 = vpop.permute.xlu0 %65  ;;  %v76_v6 = vpop.permute.xlu1 %75 }
  0x90   :  { %v71_v1 = vpop.permute.xlu0 %70 }
  0x91   :  { %v81_v17 = vpop.permute.xlu1 %80 }
  0x94   :  { %v294_v33 = vpop.permute.xlu0 %293 }
  0x95   :  { %v299_v34 = vrot.slane %v294_v33, %v298_v32 }
 0x119   :  { %v258_v62 = vpop.f32.mrb[0].mxu0 }
 0x11a   :  { %v260_v63 = vpop.f32.mrb[1].mxu0  ;;  %v259_v0 = vadd.f32 %v258_v62, %v66_v61 }
 0x11b   :  { %v261_v2 = vadd.f32 %v260_v63, %v66_v61 }
 0x11c   :  { %v281_v8 = vmax.f32 %v259_v0, 0.0 }
 0x11d   :  { %v264_v3 = vpop.f32.mrb[2].mxu0  ;;  %v282_v10 = vmax.f32 %v261_v2, 0.0 }
 0x11e   :  { %v265_v4 = vadd.f32 %v264_v3, %v71_v1  ;;  %v266_v5 = vpop.f32.mrb[3].mxu0 }
 0x11f   :  { %v267_v7 = vadd.f32 %v266_v5, %v71_v1 }
 0x120   :  { %v283_v9 = vmax.f32 %v265_v4, 0.0 }
 0x121   :  { %v284_v11 = vmax.f32 %v267_v7, 0.0  ;;  %v270_v12 = vpop.f32.mrb[4].mxu0 }
 0x122   :  { %v272_v13 = vpop.f32.mrb[5].mxu0  ;;  %v553_v14 = vpack.c.bf16 %v283_v9, %v281_v8  ;;  %v271_v16 = vadd.f32 %v270_v12, %v76_v6 }
 0x123   :  { %v551_v15 = vpack.c.bf16 %v284_v11, %v282_v10  ;;  %v273_v18 = vadd.f32 %v272_v13, %v76_v6 }
 0x124   :  { %v285_v23 = vmax.f32 %v271_v16, 0.0 }
 0x125   :  { %v276_v19 = vpop.f32.mrb[6].mxu0  ;;  %552 = vmatprep.subr.bf16.mxu1 %v551_v15  ;;  %v286_v25 = vmax.f32 %v273_v18, 0.0 }
 0x126   :  { %v277_v20 = vadd.f32 %v276_v19, %v81_v17  ;;  %v278_v21 = vpop.f32.mrb[7].mxu0  ;;  %554 = vmatpush1.bf16.msra.mxu1 %v553_v14 }
 0x127   :  { %v279_v22 = vadd.f32 %v278_v21, %v81_v17 }
 0x128   :  { %v287_v24 = vmax.f32 %v277_v20, 0.0 }
 0x129   :  { %v288_v26 = vmax.f32 %v279_v22, 0.0 }
 0x12a   :  { %v557_v27 = vpack.c.bf16 %v287_v24, %v285_v23 }
 0x12b   :  { %v555_v28 = vpack.c.bf16 %v288_v26, %v286_v25 }
 0x12d   :  { %556 = vmatprep.subr.bf16.mxu1 %v555_v28 }
 0x12e   :  { %558 = vmatpush1.bf16.msra.mxu1 %v557_v27 }
 0x131   :  { %460 = vmatmul.mubr.msk.f32.vlgmr.msra.gmra.mrb[0].mxu1 %vm300_vm2, %v289_v29 }
 0x204   :  { %v370_v35 = vpop.f32.mrb[0].mxu1 }
 0x205   :  { %v371_v36 = vadd.f32 %v370_v35, %v299_v34  ;;  %v372_v37 = vpop.f32.mrb[1].mxu1 }
 0x206   :  { %v373_v38 = vadd.f32 %v372_v37, %v299_v34 }
 0x207   :  { %v461_v39 = vmul.f32 -1.442695, %v371_v36 }
 0x208   :  { %v462_v40 = vmul.f32 -1.442695, %v373_v38 }
 0x209   :  { %565 = vpow2.f32 %v461_v39 }
 0x20a   :  { %567 = vpow2.f32 %v462_v40 }
 0x213   :  { %v566_v41 = vpop.eup %565 }
 0x214   :  { %v568_v42 = vpop.eup %567  ;;  %v381_v43 = vadd.f32 1.0, %v566_v41 }
 0x215   :  { %v382_v44 = vadd.f32 1.0, %v568_v42 }
 0x216   :  { %569 = vrcp.f32 %v381_v43 }
 0x217   :  { %571 = vrcp.f32 %v382_v44 }
 0x220   :  { %v570_v48 = vpop.eup %569 }
 0x221   :  { %v572_v50 = vpop.eup %571 }
 0x222   :  { %v389_v51 = vcombine.low %v570_v48, %v572_v50 }
 0x224   :  { %v396_v52 = vrot.slane %v389_v51, %v395_v49 }
 0x226   :  { %v403_v53 = vrot.slane %v396_v52, %v395_v49 }
 0x228   :  { %409 = vst.msk [vmem:[#allocation3] sm:$0x3] %vm407_vm3, %v403_v53 }
 0x229   :  { %584 = shalt.err (!%p581_p4)
}
 0x22a   :  { %s585_s24 = scalar_lea.hbm %s820_s5, 32 }
 0x22b   :  { %p586_p5 = scmp.ne.s32.totalorder %s820_s5, %s585_s24  ;;  %p589_p6 = scmp.lt.u32.totalorder %s585_s24, %s820_s5 }
 0x22d   :  { %p591_p7 = pnand %p589_p6, %p586_p5 }
 0x22f   :  { %594 = shalt.err (!%p591_p7)
}
 0x230   :  { %419 = dma.vmem_to_hbm [thread:$0]  %s417_s20, 32, %s820_s5, [#allocation4]  }
 0x231   :  { %595 = dma.done.wait [#allocation4], 32  }
 0x232   :  { %596 = vsyncadd [#allocation4], 4294967264 }
 0x233   :  { %423 = vsyncpa [#allocation4], 1 }

</bundles_post_ra>
